<compile_context>
chip_gen: v6e
topology: v6e:2x2x1
jax: 0.10.0
libtpu: 0.0.40
codegen_flags: <defaults>
</compile_context>

<pallas_src>
import functools

import jax
import jax.numpy as jnp
from jax.experimental import pallas as pl
from jax.experimental.pallas import tpu as pltpu


def _round_up(x, m):
    return ((x + m - 1) // m) * m


def _vmem_budget_bytes():
    """Chip-aware VMEM budget with headroom (v7x=64MiB, v5e/v6e=128MiB)."""
    cap = 64 * 1024 * 1024
    try:
        info = pltpu.get_tpu_info()
        cap = int(getattr(info, "vmem_capacity_bytes", cap))
    except Exception:
        pass
    cap = min(max(cap, 48 * 1024 * 1024), 128 * 1024 * 1024)
    return (cap * 7) // 8


def _plan(N, F):
    """Pick padded sizes, tiles, RHS residency and VMEM limit."""
    budget = _vmem_budget_bytes()
    Fp = _round_up(max(F, 128), 128)          # lane-dense features / unmasked vst
    if N <= 1024:
        Np = _round_up(max(N, 128), 128)
        tm = tk = Np                          # whole problem in one grid step
    else:
        tm, tk = 512, 2048                    # big streamed A tiles (bf16)
        Np = _round_up(N, 2048)               # divisible by both tm and tk
    # Full-resident RHS if it (double-buffered) fits comfortably.
    rhs_resident = (2 * Np * Fp * 4) <= (budget // 2)
    return Np, Fp, tm, tk, rhs_resident, budget


def _gin_layer_kernel(a_ref, h_rhs_ref, rdeg_ref, *rest,
                      one_plus_eps, tk, rhs_resident, include_self):
    """One GINConv(None, aggregator='mean') layer, row-tiled.

    Grid = (row_tiles, k_tiles).  The revisited f32 output block is the
    accumulator for raw A @ h across the contraction (k) axis; the last
    k-step applies the per-row 1/deg normalization and the (1+eps)*h term.
    """
    if include_self:
        h_self_ref, o_ref = rest
    else:
        (o_ref,) = rest

    k = pl.program_id(1)

    @pl.when(k == 0)
    def _():
        o_ref[...] = jnp.zeros_like(o_ref)

    if rhs_resident:
        start = pl.multiple_of(k * tk, tk)
        rhs = h_rhs_ref[pl.ds(start, tk), :]
    else:
        rhs = h_rhs_ref[...]

    # A tile is raw 0/1 adjacency in bf16 (lossless); accumulate in f32.
    o_ref[...] += jnp.dot(a_ref[...].astype(jnp.float32), rhs,
                          preferred_element_type=jnp.float32)

    @pl.when(k == pl.num_programs(1) - 1)
    def _():
        agg = o_ref[...] * rdeg_ref[...]               # mean = sum * (1/max(deg,1))
        if include_self:
            agg = agg + one_plus_eps * h_self_ref[...]
        o_ref[...] = agg


def gin_mean_layer(a_p, h, rdeg_p, *, one_plus_eps, tm, tk, rhs_resident,
                   vmem_bytes):
    """out = (1+eps)*h + (A @ h) * rdeg, arrays already TPU-padded."""
    Np, Fp = h.shape
    include_self = (one_plus_eps != 0.0)
    grid = (Np // tm, Np // tk)

    in_specs = [
        pl.BlockSpec((tm, tk), lambda i, k: (i, k)),          # raw adjacency tile (bf16)
        (pl.BlockSpec((Np, Fp), lambda i, k: (0, 0))          # RHS: fully VMEM-resident
         if rhs_resident else
         pl.BlockSpec((tk, Fp), lambda i, k: (k, 0))),        # RHS: k-tiled fallback
        pl.BlockSpec((tm, 1), lambda i, k: (i, 0)),           # 1/max(deg,1) row tile
    ]
    args = [a_p, h, rdeg_p]
    if include_self:
        in_specs.append(pl.BlockSpec((tm, Fp), lambda i, k: (i, 0)))  # self term rows
        args.append(h)

    kernel = functools.partial(
        _gin_layer_kernel, one_plus_eps=float(one_plus_eps), tk=tk,
        rhs_resident=rhs_resident, include_self=include_self)

    return pl.pallas_call(
        kernel,
        out_shape=jax.ShapeDtypeStruct((Np, Fp), jnp.float32),
        grid=grid,
        in_specs=in_specs,
        out_specs=pl.BlockSpec((tm, Fp), lambda i, k: (i, 0)),
        compiler_params=pltpu.CompilerParams(
            dimension_semantics=("parallel", "arbitrary"),
            vmem_limit_bytes=int(vmem_bytes)),
    )(*args)


def prepare_graph(adj, Np):
    """Padded bf16 raw adjacency + per-row reciprocal clamped degree.

    Pure graph preprocessing: cacheable across layers and forward calls
    (the graph is static in GIN_noparam).
    """
    adj = adj.astype(jnp.float32)
    N = adj.shape[0]
    deg = jnp.sum(adj, axis=1, keepdims=True)
    rdeg = 1.0 / jnp.maximum(deg, 1.0)
    a_p = jnp.zeros((Np, Np), jnp.bfloat16).at[:N, :N].set(adj.astype(jnp.bfloat16))
    rdeg_p = jnp.ones((Np, 1), jnp.float32).at[:N, :].set(rdeg)
    return a_p, rdeg_p


def gin_noparam_forward(adj, feat, num_layers=2, init_eps=-1.0):
    """GIN_noparam forward. adj: [N,N] dense (adj[v,u]=1 iff u->v), feat: [N,F]."""
    N, F = feat.shape
    Np, Fp, tm, tk, rhs_resident, vmem_bytes = _plan(N, F)

    a_p, rdeg_p = prepare_graph(adj, Np)          # cacheable across layers/calls
    h = jnp.zeros((Np, Fp), jnp.float32).at[:N, :F].set(feat.astype(jnp.float32))
    one_plus_eps = 1.0 + float(init_eps)

    hs = [h]
    for _ in range(num_layers):
        h = gin_mean_layer(a_p, h, rdeg_p, one_plus_eps=one_plus_eps,
                           tm=tm, tk=tk, rhs_resident=rhs_resident,
                           vmem_bytes=vmem_bytes)
        hs.append(h)

    # h_final = torch.cat([h0, h1, ..., hL], -1) on the un-padded region.
    return jnp.concatenate([x[:N, :F] for x in hs], axis=-1)


def gin_noparam_ref(adj, feat, num_layers=2, init_eps=-1.0):
    """Pure-JAX reference mirroring the PyTorch module line-by-line."""
    adj = adj.astype(jnp.float32)
    feat = feat.astype(jnp.float32)
    deg = jnp.sum(adj, axis=1, keepdims=True)
    h = feat
    outs = [h]
    for _ in range(num_layers):
        agg = (adj @ h) / jnp.maximum(deg, 1.0)   # GINConv 'mean' aggregation
        h = (1.0 + init_eps) * h + agg            # apply_func=None, no activation
        outs.append(h)
    return jnp.concatenate(outs, axis=-1)


def _random_graph(key, n, p=0.05):
    """Deterministic random undirected graph (no self-loops), dense adjacency."""
    upper = jnp.triu((jax.random.uniform(key, (n, n)) < p).astype(jnp.float32), k=1)
    return upper + upper.T


if __name__ == "__main__":
    key = jax.random.PRNGKey(0)
    k_feat, k_adj, k_feat2, k_adj2 = jax.random.split(key, 4)

    # --- 1) small-graph path (single grid step), module default init_eps=-1 ---
    N, F, L = 256, 32, 2
    feat = jax.random.normal(k_feat, (N, F), dtype=jnp.float32)
    adj = _random_graph(k_adj, N, 0.05)
    out = jax.block_until_ready(gin_noparam_forward(adj, feat, num_layers=L, init_eps=-1.0))
    ref = gin_noparam_ref(adj, feat, num_layers=L, init_eps=-1.0)
    assert out.shape == (N, F * (L + 1)) and out.dtype == jnp.float32
    assert jnp.allclose(out, ref, atol=1e-4, rtol=1e-4), float(jnp.max(jnp.abs(out - ref)))

    # --- 2) nonzero (1+eps) self-term path on the same small graph ---
    out2 = jax.block_until_ready(gin_noparam_forward(adj, feat, num_layers=L, init_eps=0.5))
    ref2 = gin_noparam_ref(adj, feat, num_layers=L, init_eps=0.5)
    assert jnp.allclose(out2, ref2, atol=1e-4, rtol=1e-4), float(jnp.max(jnp.abs(out2 - ref2)))

    # --- 3) tiled large-graph path (row-parallel grid + k accumulation) ---
    N3, F3 = 3000, 32
    feat3 = jax.random.normal(k_feat2, (N3, F3), dtype=jnp.float32)
    adj3 = _random_graph(k_adj2, N3, 0.02)
    out3 = jax.block_until_ready(gin_noparam_forward(adj3, feat3, num_layers=L, init_eps=-1.0))
    ref3 = gin_noparam_ref(adj3, feat3, num_layers=L, init_eps=-1.0)
    assert out3.shape == (N3, F3 * (L + 1))
    assert jnp.allclose(out3, ref3, atol=1e-4, rtol=1e-4), float(jnp.max(jnp.abs(out3 - ref3)))

    # TODO(synk): the DGL graph object / sparse message passing is represented as a
    # dense adjacency matmul; a CSR gather-based variant would be needed for very
    # sparse, very large graphs.
    print("KERNEL_OK")
</pallas_src>

<mosaic_0001>
module attributes {stable_mosaic.version = 11 : i64} {
  func.func @_gin_layer_kernel(%arg0: i32, %arg1: i32, %arg2: memref<256x256xbf16, #tpu.memory_space<vmem>>, %arg3: memref<256x128xf32, #tpu.memory_space<vmem>>, %arg4: memref<256x1xf32, #tpu.memory_space<vmem>>, %arg5: memref<256x128xf32, #tpu.memory_space<vmem>>) attributes {dimension_semantics = [#tpu.dimension_semantics<parallel>, #tpu.dimension_semantics<arbitrary>], iteration_bounds = array<i64: 1, 1>, scalar_prefetch = 0 : i64, scratch_operands = 0 : i64, tpu.core_type = #tpu.core_type<tc>, window_params = [{transform_indices = @transform_0, window_bounds = array<i64: 256, 256>}, {pipeline_mode = #tpu.pipeline_mode<synchronous>, transform_indices = @transform_1, window_bounds = array<i64: 256, 128>}, {transform_indices = @transform_2, window_bounds = array<i64: 256, 1>}, {transform_indices = @transform_3, window_bounds = array<i64: 256, 128>}]} {
    %c0_i32 = arith.constant 0 : i32
    %0 = arith.cmpi eq, %arg1, %c0_i32 : i32
    %1 = arith.extui %0 : i1 to i32
    %c0_i32_0 = arith.constant 0 : i32
    %2 = arith.cmpi ne, %1, %c0_i32_0 : i32
    scf.if %2 {
      %cst_9 = arith.constant 0.000000e+00 : f32
      %16 = vector.broadcast %cst_9 : f32 to vector<256x128xf32>
      %c0_10 = arith.constant 0 : index
      %c0_11 = arith.constant 0 : index
      %17 = vector.load %arg5[%c0_10, %c0_11] : memref<256x128xf32, #tpu.memory_space<vmem>>, vector<256x128xf32>
      tpu.vector_store %arg5[%c0_10, %c0_11], %16 {strides = array<i32>} : memref<256x128xf32, #tpu.memory_space<vmem>>, vector<256x128xf32>,
    } else {
    }
    %c256_i32 = arith.constant 256 : i32
    %3 = arith.muli %arg1, %c256_i32 : i32
    %4 = tpu.assume_multiple %3, 256 : i32
    %5 = arith.index_cast %4 : i32 to index
    %c0 = arith.constant 0 : index
    %6 = vector.load %arg3[%5, %c0] : memref<256x128xf32, #tpu.memory_space<vmem>>, vector<256x128xf32>
    %c0_1 = arith.constant 0 : index
    %c0_2 = arith.constant 0 : index
    %7 = vector.load %arg5[%c0_1, %c0_2] : memref<256x128xf32, #tpu.memory_space<vmem>>, vector<256x128xf32>
    %c0_3 = arith.constant 0 : index
    %c0_4 = arith.constant 0 : index
    %8 = vector.load %arg2[%c0_3, %c0_4] : memref<256x256xbf16, #tpu.memory_space<vmem>>, vector<256x256xbf16>
    %9 = arith.extf %8 : vector<256x256xbf16> to vector<256x256xf32>
    %cst = arith.constant dense<0.000000e+00> : vector<256x128xf32>
    %10 = tpu.matmul %9, %6, %cst {dimension_numbers = #tpu.dot_dimension_numbers<[1], [0], [0], [1], [0, 0, 1, 1], [], []>} : vector<256x256xf32>, vector<256x128xf32>, vector<256x128xf32> -> vector<256x128xf32>
    %11 = arith.addf %7, %10 : vector<256x128xf32>
    %c0_5 = arith.constant 0 : index
    %c0_6 = arith.constant 0 : index
    %12 = vector.load %arg5[%c0_5, %c0_6] : memref<256x128xf32, #tpu.memory_space<vmem>>, vector<256x128xf32>
    tpu.vector_store %arg5[%c0_5, %c0_6], %11 {strides = array<i32>} : memref<256x128xf32, #tpu.memory_space<vmem>>, vector<256x128xf32>,
    %c0_i32_7 = arith.constant 0 : i32
    %13 = arith.cmpi eq, %arg1, %c0_i32_7 : i32
    %14 = arith.extui %13 : i1 to i32
    %c0_i32_8 = arith.constant 0 : i32
    %15 = arith.cmpi ne, %14, %c0_i32_8 : i32
    scf.if %15 {
      %c0_9 = arith.constant 0 : index
      %c0_10 = arith.constant 0 : index
      %16 = vector.load %arg5[%c0_9, %c0_10] : memref<256x128xf32, #tpu.memory_space<vmem>>, vector<256x128xf32>
      %c0_11 = arith.constant 0 : index
      %c0_12 = arith.constant 0 : index
      %17 = vector.load %arg4[%c0_11, %c0_12] : memref<256x1xf32, #tpu.memory_space<vmem>>, vector<256x1xf32>
      %18 = vector.broadcast %17 : vector<256x1xf32> to vector<256x128xf32>
      %19 = arith.mulf %16, %18 : vector<256x128xf32>
      %c0_13 = arith.constant 0 : index
      %c0_14 = arith.constant 0 : index
      %20 = vector.load %arg5[%c0_13, %c0_14] : memref<256x128xf32, #tpu.memory_space<vmem>>, vector<256x128xf32>
      tpu.vector_store %arg5[%c0_13, %c0_14], %19 {strides = array<i32>} : memref<256x128xf32, #tpu.memory_space<vmem>>, vector<256x128xf32>,
    } else {
    }
    return
  }
  func.func @transform_0(%arg0: i32, %arg1: i32) -> (i32, i32) {
    %c0_i32 = arith.constant 0 : i32
    return %arg0, %arg1 : i32, i32
  }
  func.func @transform_1(%arg0: i32, %arg1: i32) -> (i32, i32) {
    %c0_i32 = arith.constant 0 : i32
    %c0_i32_0 = arith.constant 0 : i32
    %c0_i32_1 = arith.constant 0 : i32
    return %c0_i32, %c0_i32_0 : i32, i32
  }
  func.func @transform_2(%arg0: i32, %arg1: i32) -> (i32, i32) {
    %c0_i32 = arith.constant 0 : i32
    %c0_i32_0 = arith.constant 0 : i32
    return %arg0, %c0_i32 : i32, i32
  }
  func.func @transform_3(%arg0: i32, %arg1: i32) -> (i32, i32) {
    %c0_i32 = arith.constant 0 : i32
    %c0_i32_0 = arith.constant 0 : i32
    return %arg0, %c0_i32 : i32, i32
  }
}

</mosaic_0001>

<bundles_post_ra>
// kernel: tpu_custom_call.1
= control target key start
LH: loop header
LB: loop body
LE: loop exit
PB: predicated region body
PF: predicated region fallthrough
CT: control target
= control target key end

     0   :  { %8 = vsyncpa [#allocation3], 0  ;;  %s1264_s0 = inlined_call_operand.vmem [shape: bf16[256,256], index: 0, kind: input, shape index: {}]   ;;  %s1265_s1 = inlined_call_operand.hbm [shape: f32[256,128], index: 1, kind: input, shape index: {}]   ;;  %s1266_s2 = inlined_call_operand.vmem [shape: f32[256,1], index: 2, kind: input, shape index: {}]   ;;  %s1267_s3 = inlined_call_operand.hbm [shape: f32[256,128], index: 3, kind: output, shape index: {}]  }
   0x1   :  { %9 = vsyncpa [#allocation4], 0  ;;  %s940_s12 = smov [#allocation2]  }
   0x2   :  { %s17_s13 = sshll.u32 %s940_s12, 4  ;;  %s18_s13 = int_to_ptr.vmem [resolvable:$true] %s17_s13 }
   0x3   :  { %s904_s14 = scalar_lea.vmem %s18_s13, 4096  ;;  %p909_p1 = scmp.lt.s32.totalorder %s18_s13, %s18_s13 }
   0x4   :  { %p905_p0 = scmp.ne.s32.totalorder %s18_s13, %s904_s14  ;;  %p910_p2 = scmp.lt.s32.totalorder %s904_s14, %s904_s14 }
   0x6   :  { %p911_p3 = por %p910_p2, %p909_p1 }
   0x8   :  { %p912_p4 = pnand %p911_p3, %p905_p0 }
   0xa   :  { %915 = shalt.err (!%p912_p4)
}
   0xb   :  { %s941_s15 = smov 128   ;;  %s942_s16 = smov 8  }
   0xc   :  { %23 = dma.hbm_to_vmem [thread:$0]  %s1265_s1, 4096, %s18_s13, [#allocation3], %s941_s15, %s941_s15, %s942_s16  }
   0xd   :  { %936 = dma.done.wait [#allocation3], 4096  }
   0xe   :  { %937 = vsyncadd [#allocation3], 4294963200  ;;  %v943_v0 = vmov 0.0   ;;  %v944_v1 = vmov 0   ;;  %v82_v2 = vld [vmem:[#allocation2 + $0x78] sm:$0xff]  ;;  %v81_v3 = vld [vmem:[#allocation2 + $0x70] sm:$0xff] }
   0xf   :  { %227 = vmatprep.subr.mxu0 %v943_v0  ;;  %824 = vmatprep.subr.mxu1 %v943_v0  ;;  %v80_v4 = vld [vmem:[#allocation2 + $0x68] sm:$0xff]  ;;  %v79_v5 = vld [vmem:[#allocation2 + $0x60] sm:$0xff]  ;;  %v78_v6 = vld [vmem:[#allocation2 + $0x58] sm:$0xff] }
  0x10   :  { %895 = vset.pattern.permute.xlu1 %v944_v1  ;;  %894 = vset.pattern.permute.xlu0 %v944_v1  ;;  %v77_v7 = vld [vmem:[#allocation2 + $0x50] sm:$0xff]  ;;  %v76_v8 = vld [vmem:[#allocation2 + $0x48] sm:$0xff]  ;;  %v75_v9 = vld [vmem:[#allocation2 + $0x40] sm:$0xff] }
  0x11   :  { %228 = vmatpush1.msra.mxu0 %v82_v2  ;;  %856 = vmatpush1.msra.mxu1 %v82_v2  ;;  %v74_v10 = vld [vmem:[#allocation2 + $0x38] sm:$0xff]  ;;  %v73_v11 = vld [vmem:[#allocation2 + $0x30] sm:$0xff]  ;;  %v72_v12 = vld [vmem:[#allocation2 + $0x28] sm:$0xff] }
  0x12   :  { %229 = vmatprep.subr.mxu0 %v943_v0  ;;  %825 = vmatprep.subr.mxu1 %v943_v0  ;;  %v71_v13 = vld [vmem:[#allocation2 + $0x20] sm:$0xff]  ;;  %v70_v14 = vld [vmem:[#allocation2 + $0x18] sm:$0xff]  ;;  %v69_v15 = vld [vmem:[#allocation2 + $0x10] sm:$0xff] }
  0x13   :  { %230 = vmatpush1.msra.mxu0 %v81_v3  ;;  %857 = vmatpush1.msra.mxu1 %v81_v3  ;;  %v68_v16 = vld [vmem:[#allocation2 + $0x8] sm:$0xff]  ;;  %v67_v17 = vld [vmem:[#allocation2] sm:$0xff]  ;;  %v98_v18 = vld [vmem:[#allocation2 + $0xf8] sm:$0xff] }
  0x14   :  { %231 = vmatprep.subr.mxu0 %v943_v0  ;;  %826 = vmatprep.subr.mxu1 %v943_v0  ;;  %v97_v19 = vld [vmem:[#allocation2 + $0xf0] sm:$0xff]  ;;  %v96_v20 = vld [vmem:[#allocation2 + $0xe8] sm:$0xff]  ;;  %v95_v21 = vld [vmem:[#allocation2 + $0xe0] sm:$0xff] }
  0x15   :  { %232 = vmatpush1.msra.mxu0 %v80_v4  ;;  %858 = vmatpush1.msra.mxu1 %v80_v4  ;;  %v94_v22 = vld [vmem:[#allocation2 + $0xd8] sm:$0xff]  ;;  %v93_v23 = vld [vmem:[#allocation2 + $0xd0] sm:$0xff]  ;;  %v92_v24 = vld [vmem:[#allocation2 + $0xc8] sm:$0xff] }
  0x16   :  { %233 = vmatprep.subr.mxu0 %v943_v0  ;;  %827 = vmatprep.subr.mxu1 %v943_v0  ;;  %v91_v25 = vld [vmem:[#allocation2 + $0xc0] sm:$0xff]  ;;  %v90_v26 = vld [vmem:[#allocation2 + $0xb8] sm:$0xff]  ;;  %v89_v27 = vld [vmem:[#allocation2 + $0xb0] sm:$0xff] }
  0x17   :  { %234 = vmatpush1.msra.mxu0 %v79_v5  ;;  %859 = vmatpush1.msra.mxu1 %v79_v5  ;;  %v88_v28 = vld [vmem:[#allocation2 + $0xa8] sm:$0xff]  ;;  %v87_v29 = vld [vmem:[#allocation2 + $0xa0] sm:$0xff]  ;;  %v86_v30 = vld [vmem:[#allocation2 + $0x98] sm:$0xff] }
  0x18   :  { %235 = vmatprep.subr.mxu0 %v943_v0  ;;  %828 = vmatprep.subr.mxu1 %v943_v0  ;;  %v85_v31 = vld [vmem:[#allocation2 + $0x90] sm:$0xff]  ;;  %v131_v32 = vld [vmem:[%s1264_s0] sm:$0xff]  ;;  %v84_v34 = vld [vmem:[#allocation2 + $0x88] sm:$0xff] }
  0x19   :  { %236 = vmatpush1.msra.mxu0 %v78_v6  ;;  %860 = vmatpush1.msra.mxu1 %v78_v6  ;;  %v147_v33 = vld [vmem:[%s1264_s0 + $0x80] sm:$0xff]  ;;  %v132_v35 = vld [vmem:[%s1264_s0 + $0x8] sm:$0xff]  ;;  %v164_v38 = vunpack.c.h.bf16 %v131_v32  ;;  %v163_v40 = vunpack.c.l.bf16 %v131_v32  ;;  %v133_v44 = vld [vmem:[%s1264_s0 + $0x10] sm:$0xff] }
  0x1a   :  { %237 = vmatprep.subr.mxu0 %v943_v0  ;;  %829 = vmatprep.subr.mxu1 %v943_v0  ;;  %v148_v36 = vld [vmem:[%s1264_s0 + $0x88] sm:$0xff]  ;;  %v83_v37 = vld [vmem:[#allocation2 + $0x80] sm:$0xff]  ;;  %v196_v39 = vunpack.c.h.bf16 %v147_v33  ;;  %v195_v41 = vunpack.c.l.bf16 %v147_v33  ;;  %v166_v42 = vunpack.c.h.bf16 %v132_v35  ;;  %v149_v45 = vld [vmem:[%s1264_s0 + $0x90] sm:$0xff]  ;;  %v165_v48 = vunpack.c.l.bf16 %v132_v35 }
  0x1b   :  { %238 = vmatpush1.msra.mxu0 %v77_v7  ;;  %861 = vmatpush1.msra.mxu1 %v77_v7  ;;  %v198_v43 = vunpack.c.h.bf16 %v148_v36  ;;  %v553_v46 = vld [vmem:[%s1266_s2 + $0x10] sm:$0xff]  ;;  %v551_v47 = vld [vmem:[%s1266_s2] sm:$0xff]  ;;  %v197_v49 = vunpack.c.l.bf16 %v148_v36  ;;  %v168_v50 = vunpack.c.h.bf16 %v133_v44  ;;  %v200_v51 = vunpack.c.h.bf16 %v149_v45  ;;  %v134_v52 = vld [vmem:[%s1264_s0 + $0x18] sm:$0xff] }
  0x1c   :  { %239 = vmatprep.subr.mxu0 %v943_v0  ;;  %830 = vmatprep.subr.mxu1 %v943_v0  ;;  %v150_v53 = vld [vmem:[%s1264_s0 + $0x98] sm:$0xff]  ;;  %v552_v55 = vld [vmem:[%s1266_s2 + $0x8] sm:$0xff]  ;;  %v167_v56 = vunpack.c.l.bf16 %v133_v44  ;;  %v199_v57 = vunpack.c.l.bf16 %v149_v45  ;;  %v170_v58 = vunpack.c.h.bf16 %v134_v52  ;;  %v135_v60 = vld [vmem:[%s1264_s0 + $0x20] sm:$0xff] }
  0x1d   :  { %240 = vmatpush1.msra.mxu0 %v76_v8  ;;  %862 = vmatpush1.msra.mxu1 %v76_v8  ;;  %v554_v54 = vld [vmem:[%s1266_s2 + $0x18] sm:$0xff]  ;;  %v202_v59 = vunpack.c.h.bf16 %v150_v53  ;;  %v151_v61 = vld [vmem:[%s1264_s0 + $0xa0] sm:$0xff]  ;;  %v556_v62 = vld [vmem:[%s1266_s2 + $0x28] sm:$0xff]  ;;  %v201_v1 = vunpack.c.l.bf16 %v150_v53  ;;  %v172_v2 = vunpack.c.h.bf16 %v135_v60  ;;  %v171_v8 = vunpack.c.l.bf16 %v135_v60 }
  0x1e   :  { %241 = vmatprep.subr.mxu0 %v943_v0  ;;  %831 = vmatprep.subr.mxu1 %v943_v0  ;;  %v555_v63 = vld [vmem:[%s1266_s2 + $0x20] sm:$0xff]  ;;  %v204_v3 = vunpack.c.h.bf16 %v151_v61  ;;  %v136_v4 = vld [vmem:[%s1264_s0 + $0x28] sm:$0xff]  ;;  %v558_v6 = vld [vmem:[%s1266_s2 + $0x38] sm:$0xff] }
  0x1f   :  { %242 = vmatpush1.msra.mxu0 %v75_v9  ;;  %863 = vmatpush1.msra.mxu1 %v75_v9  ;;  %v152_v5 = vld [vmem:[%s1264_s0 + $0xa8] sm:$0xff]  ;;  %v557_v7 = vld [vmem:[%s1266_s2 + $0x30] sm:$0xff]  ;;  %v203_v9 = vunpack.c.l.bf16 %v151_v61  ;;  %v158_v53 = vld [vmem:[%s1264_s0 + $0xd8] sm:$0xff] }
  0x20   :  { %243 = vmatprep.subr.mxu0 %v943_v0  ;;  %832 = vmatprep.subr.mxu1 %v943_v0  ;;  %v140_v36 = vld [vmem:[%s1264_s0 + $0x48] sm:$0xff]  ;;  %v141_v44 = vld [vmem:[%s1264_s0 + $0x50] sm:$0xff]  ;;  %v143_v60 = vld [vmem:[%s1264_s0 + $0x60] sm:$0xff] }
  0x21   :  { %244 = vmatpush1.msra.mxu0 %v74_v10  ;;  %864 = vmatpush1.msra.mxu1 %v74_v10  ;;  %v174_v10 = vunpack.c.h.bf16 %v136_v4  ;;  %v157_v45 = vld [vmem:[%s1264_s0 + $0xd0] sm:$0xff]  ;;  %v159_v61 = vld [vmem:[%s1264_s0 + $0xe0] sm:$0xff] }
  0x22   :  { %245 = vmatprep.subr.mxu0 %v943_v0  ;;  %833 = vmatprep.subr.mxu1 %v943_v0 }
  0x23   :  { %246 = vmatpush1.msra.mxu0 %v73_v11  ;;  %865 = vmatpush1.msra.mxu1 %v73_v11  ;;  %v206_v11 = vunpack.c.h.bf16 %v152_v5 }
  0x24   :  { %247 = vmatprep.subr.mxu0 %v943_v0  ;;  %834 = vmatprep.subr.mxu1 %v943_v0 }
  0x25   :  { %248 = vmatpush1.msra.mxu0 %v72_v12  ;;  %866 = vmatpush1.msra.mxu1 %v72_v12  ;;  %v137_v12 = vld [vmem:[%s1264_s0 + $0x30] sm:$0xff] }
  0x26   :  { %249 = vmatprep.subr.mxu0 %v943_v0  ;;  %835 = vmatprep.subr.mxu1 %v943_v0 }
  0x27   :  { %250 = vmatpush1.msra.mxu0 %v71_v13  ;;  %867 = vmatpush1.msra.mxu1 %v71_v13  ;;  %v153_v13 = vld [vmem:[%s1264_s0 + $0xb0] sm:$0xff] }
  0x28   :  { %251 = vmatprep.subr.mxu0 %v943_v0  ;;  %836 = vmatprep.subr.mxu1 %v943_v0 }
  0x29   :  { %252 = vmatpush1.msra.mxu0 %v70_v14  ;;  %868 = vmatpush1.msra.mxu1 %v70_v14  ;;  %v560_v14 = vld [vmem:[%s1266_s2 + $0x48] sm:$0xff] }
  0x2a   :  { %253 = vmatprep.subr.mxu0 %v943_v0  ;;  %837 = vmatprep.subr.mxu1 %v943_v0 }
  0x2b   :  { %254 = vmatpush1.msra.mxu0 %v69_v15  ;;  %869 = vmatpush1.msra.mxu1 %v69_v15  ;;  %v559_v15 = vld [vmem:[%s1266_s2 + $0x40] sm:$0xff] }
  0x2c   :  { %255 = vmatprep.subr.mxu0 %v943_v0  ;;  %838 = vmatprep.subr.mxu1 %v943_v0 }
  0x2d   :  { %256 = vmatpush1.msra.mxu0 %v68_v16  ;;  %870 = vmatpush1.msra.mxu1 %v68_v16  ;;  %v173_v16 = vunpack.c.l.bf16 %v136_v4  ;;  %v144_v4 = vld [vmem:[%s1264_s0 + $0x68] sm:$0xff] }
  0x2e   :  { %257 = vmatprep.subr.mxu0 %v943_v0  ;;  %839 = vmatprep.subr.mxu1 %v943_v0 }
  0x2f   :  { %258 = vmatpush1.msra.mxu0 %v67_v17  ;;  %871 = vmatpush1.msra.mxu1 %v67_v17  ;;  %v205_v17 = vunpack.c.l.bf16 %v152_v5  ;;  %v160_v5 = vld [vmem:[%s1264_s0 + $0xe8] sm:$0xff] }
  0x30   :  { %259 = vmatprep.subr.mxu0 %v943_v0  ;;  %840 = vmatprep.subr.mxu1 %v943_v0 }
  0x31   :  { %260 = vmatpush2.msra.mxu0 %v98_v18  ;;  %872 = vmatpush2.msra.mxu1 %v98_v18  ;;  %v176_v18 = vunpack.c.h.bf16 %v137_v12 }
  0x32   :  { %261 = vmatprep.subr.mxu0 %v943_v0  ;;  %841 = vmatprep.subr.mxu1 %v943_v0 }
  0x33   :  { %262 = vmatpush2.msra.mxu0 %v97_v19  ;;  %873 = vmatpush2.msra.mxu1 %v97_v19  ;;  %v208_v19 = vunpack.c.h.bf16 %v153_v13 }
  0x34   :  { %263 = vmatprep.subr.mxu0 %v943_v0  ;;  %842 = vmatprep.subr.mxu1 %v943_v0 }
  0x35   :  { %264 = vmatpush2.msra.mxu0 %v96_v20  ;;  %874 = vmatpush2.msra.mxu1 %v96_v20  ;;  %v138_v20 = vld [vmem:[%s1264_s0 + $0x38] sm:$0xff] }
  0x36   :  { %265 = vmatprep.subr.mxu0 %v943_v0  ;;  %843 = vmatprep.subr.mxu1 %v943_v0  ;;  %v177_v32 = vunpack.c.l.bf16 %v138_v20 }
  0x37   :  { %266 = vmatpush2.msra.mxu0 %v95_v21  ;;  %875 = vmatpush2.msra.mxu1 %v95_v21  ;;  %v154_v21 = vld [vmem:[%s1264_s0 + $0xb8] sm:$0xff] }
  0x38   :  { %267 = vmatprep.subr.mxu0 %v943_v0  ;;  %844 = vmatprep.subr.mxu1 %v943_v0  ;;  %v209_v33 = vunpack.c.l.bf16 %v154_v21 }
  0x39   :  { %268 = vmatpush2.msra.mxu0 %v94_v22  ;;  %876 = vmatpush2.msra.mxu1 %v94_v22  ;;  %v562_v22 = vld [vmem:[%s1266_s2 + $0x58] sm:$0xff] }
  0x3a   :  { %269 = vmatprep.subr.mxu0 %v943_v0  ;;  %845 = vmatprep.subr.mxu1 %v943_v0 }
  0x3b   :  { %270 = vmatpush2.msra.mxu0 %v93_v23  ;;  %877 = vmatpush2.msra.mxu1 %v93_v23  ;;  %v561_v23 = vld [vmem:[%s1266_s2 + $0x50] sm:$0xff] }
  0x3c   :  { %271 = vmatprep.subr.mxu0 %v943_v0  ;;  %846 = vmatprep.subr.mxu1 %v943_v0 }
  0x3d   :  { %272 = vmatpush2.msra.mxu0 %v92_v24  ;;  %878 = vmatpush2.msra.mxu1 %v92_v24  ;;  %v175_v24 = vunpack.c.l.bf16 %v137_v12  ;;  %v145_v12 = vld [vmem:[%s1264_s0 + $0x70] sm:$0xff] }
  0x3e   :  { %273 = vmatprep.subr.mxu0 %v943_v0  ;;  %847 = vmatprep.subr.mxu1 %v943_v0 }
  0x3f   :  { %274 = vmatpush2.msra.mxu0 %v91_v25  ;;  %879 = vmatpush2.msra.mxu1 %v91_v25  ;;  %v207_v25 = vunpack.c.l.bf16 %v153_v13  ;;  %v161_v13 = vld [vmem:[%s1264_s0 + $0xf0] sm:$0xff] }
  0x40   :  { %275 = vmatprep.subr.mxu0 %v943_v0  ;;  %848 = vmatprep.subr.mxu1 %v943_v0 }
  0x41   :  { %276 = vmatpush2.msra.mxu0 %v90_v26  ;;  %880 = vmatpush2.msra.mxu1 %v90_v26  ;;  %v178_v26 = vunpack.c.h.bf16 %v138_v20  ;;  %v146_v20 = vld [vmem:[%s1264_s0 + $0x78] sm:$0xff] }
  0x42   :  { %277 = vmatprep.subr.mxu0 %v943_v0  ;;  %849 = vmatprep.subr.mxu1 %v943_v0 }
  0x43   :  { %278 = vmatpush2.msra.mxu0 %v89_v27  ;;  %881 = vmatpush2.msra.mxu1 %v89_v27  ;;  %v210_v27 = vunpack.c.h.bf16 %v154_v21  ;;  %v162_v21 = vld [vmem:[%s1264_s0 + $0xf8] sm:$0xff] }
  0x44   :  { %279 = vmatprep.subr.mxu0 %v943_v0  ;;  %850 = vmatprep.subr.mxu1 %v943_v0 }
  0x45   :  { %280 = vmatpush2.msra.mxu0 %v88_v28  ;;  %882 = vmatpush2.msra.mxu1 %v88_v28  ;;  %v139_v28 = vld [vmem:[%s1264_s0 + $0x40] sm:$0xff] }
  0x46   :  { %281 = vmatprep.subr.mxu0 %v943_v0  ;;  %851 = vmatprep.subr.mxu1 %v943_v0 }
  0x47   :  { %282 = vmatpush2.msra.mxu0 %v87_v29  ;;  %883 = vmatpush2.msra.mxu1 %v87_v29  ;;  %v155_v29 = vld [vmem:[%s1264_s0 + $0xc0] sm:$0xff] }
  0x48   :  { %283 = vmatprep.subr.mxu0 %v943_v0  ;;  %852 = vmatprep.subr.mxu1 %v943_v0  ;;  %v212_v35 = vunpack.c.h.bf16 %v155_v29 }
  0x49   :  { %284 = vmatpush2.msra.mxu0 %v86_v30  ;;  %884 = vmatpush2.msra.mxu1 %v86_v30  ;;  %v564_v30 = vld [vmem:[%s1266_s2 + $0x68] sm:$0xff] }
  0x4a   :  { %285 = vmatprep.subr.mxu0 %v943_v0  ;;  %853 = vmatprep.subr.mxu1 %v943_v0 }
  0x4b   :  { %286 = vmatpush2.msra.mxu0 %v85_v31  ;;  %885 = vmatpush2.msra.mxu1 %v85_v31  ;;  %v563_v31 = vld [vmem:[%s1266_s2 + $0x60] sm:$0xff] }
  0x4c   :  { %287 = vmatprep.subr.mxu0 %v943_v0  ;;  %854 = vmatprep.subr.mxu1 %v943_v0 }
  0x4d   :  { %288 = vmatpush2.msra.mxu0 %v84_v34  ;;  %886 = vmatpush2.msra.mxu1 %v84_v34  ;;  %v180_v34 = vunpack.c.h.bf16 %v139_v28 }
  0x4e   :  { %289 = vmatprep.subr.mxu0 %v943_v0  ;;  %855 = vmatprep.subr.mxu1 %v943_v0  ;;  %v169_v0 = vunpack.c.l.bf16 %v134_v52  ;;  %v142_v52 = vld [vmem:[%s1264_s0 + $0x58] sm:$0xff] }
  0x4f   :  { %290 = vmatpush2.msra.mxu0 %v83_v37  ;;  %887 = vmatpush2.msra.mxu1 %v83_v37  ;;  %v156_v37 = vld [vmem:[%s1264_s0 + $0xc8] sm:$0xff] }
  0x50   :  { %291 = vmatprep.mubr.f32.mxu0 %v164_v38  ;;  %371 = vmatprep.mubr.f32.mxu1 %v196_v39  ;;  %v566_v38 = vld [vmem:[%s1266_s2 + $0x78] sm:$0xff]  ;;  %v565_v39 = vld [vmem:[%s1266_s2 + $0x70] sm:$0xff] }
  0x51   :  { %292 = vmatmul.mubr.f32.vlgmr.msra.gmra.mxu0 %v163_v40  ;;  %372 = vmatmul.mubr.f32.vlgmr.msra.gmra.mxu1 %v195_v41  ;;  %v179_v40 = vunpack.c.l.bf16 %v139_v28  ;;  %v211_v41 = vunpack.c.l.bf16 %v155_v29  ;;  %v580_v28 = vld [vmem:[%s1266_s2 + $0xe8] sm:$0xff]  ;;  %v579_v29 = vld [vmem:[%s1266_s2 + $0xe0] sm:$0xff] }
  0x52   :  { %296 = vmatprep.mubr.f32.mxu0 %v166_v42  ;;  %376 = vmatprep.mubr.f32.mxu1 %v198_v43  ;;  %v182_v42 = vunpack.c.h.bf16 %v140_v36  ;;  %v214_v43 = vunpack.c.h.bf16 %v156_v37 }
  0x53   :  { %595 = vperm.xlu1 %895, %v553_v46   ;;  %585 = vperm.xlu0 %894, %v551_v47   ;;  %v568_v46 = vld [vmem:[%s1266_s2 + $0x88] sm:$0xff]  ;;  %v567_v47 = vld [vmem:[%s1266_s2 + $0x80] sm:$0xff] }
  0x55   :  { %297 = vmatmul.mubr.f32.gmra.mxu0 %v165_v48  ;;  %377 = vmatmul.mubr.f32.gmra.mxu1 %v197_v49  ;;  %v181_v48 = vunpack.c.l.bf16 %v140_v36  ;;  %v213_v49 = vunpack.c.l.bf16 %v156_v37 }
  0x56   :  { %301 = vmatprep.mubr.f32.mxu0 %v168_v50  ;;  %381 = vmatprep.mubr.f32.mxu1 %v200_v51  ;;  %v184_v50 = vunpack.c.h.bf16 %v141_v44  ;;  %v216_v51 = vunpack.c.h.bf16 %v157_v45 }
  0x57   :  { %600 = vperm.xlu1 %895, %v554_v54   ;;  %590 = vperm.xlu0 %894, %v552_v55   ;;  %v570_v54 = vld [vmem:[%s1266_s2 + $0x98] sm:$0xff]  ;;  %v569_v55 = vld [vmem:[%s1266_s2 + $0x90] sm:$0xff] }
  0x59   :  { %302 = vmatmul.mubr.f32.gmra.mxu0 %v167_v56  ;;  %382 = vmatmul.mubr.f32.gmra.mxu1 %v199_v57  ;;  %v183_v56 = vunpack.c.l.bf16 %v141_v44  ;;  %v215_v57 = vunpack.c.l.bf16 %v157_v45 }
  0x5a   :  { %306 = vmatprep.mubr.f32.mxu0 %v170_v58  ;;  %386 = vmatprep.mubr.f32.mxu1 %v202_v59  ;;  %v186_v58 = vunpack.c.h.bf16 %v142_v52  ;;  %v218_v59 = vunpack.c.h.bf16 %v158_v53 }
  0x5b   :  { %610 = vperm.xlu1 %895, %v556_v62   ;;  %605 = vperm.xlu0 %894, %v555_v63   ;;  %v572_v62 = vld [vmem:[%s1266_s2 + $0xa8] sm:$0xff]  ;;  %v571_v63 = vld [vmem:[%s1266_s2 + $0xa0] sm:$0xff] }
  0x5d   :  { %307 = vmatmul.mubr.f32.gmra.mxu0 %v169_v0  ;;  %387 = vmatmul.mubr.f32.gmra.mxu1 %v201_v1  ;;  %v185_v0 = vunpack.c.l.bf16 %v142_v52  ;;  %v217_v1 = vunpack.c.l.bf16 %v158_v53 }
  0x5e   :  { %311 = vmatprep.mubr.f32.mxu0 %v172_v2  ;;  %391 = vmatprep.mubr.f32.mxu1 %v204_v3  ;;  %v188_v2 = vunpack.c.h.bf16 %v143_v60  ;;  %v220_v3 = vunpack.c.h.bf16 %v159_v61 }
  0x5f   :  { %620 = vperm.xlu1 %895, %v558_v6   ;;  %615 = vperm.xlu0 %894, %v557_v7   ;;  %v574_v6 = vld [vmem:[%s1266_s2 + $0xb8] sm:$0xff]  ;;  %v573_v7 = vld [vmem:[%s1266_s2 + $0xb0] sm:$0xff] }
  0x61   :  { %312 = vmatmul.mubr.f32.gmra.mxu0 %v171_v8  ;;  %392 = vmatmul.mubr.f32.gmra.mxu1 %v203_v9  ;;  %v187_v8 = vunpack.c.l.bf16 %v143_v60  ;;  %v219_v9 = vunpack.c.l.bf16 %v159_v61 }
  0x62   :  { %316 = vmatprep.mubr.f32.mxu0 %v174_v10  ;;  %396 = vmatprep.mubr.f32.mxu1 %v206_v11  ;;  %v190_v10 = vunpack.c.h.bf16 %v144_v4  ;;  %v222_v11 = vunpack.c.h.bf16 %v160_v5 }
  0x63   :  { %630 = vperm.xlu1 %895, %v560_v14   ;;  %625 = vperm.xlu0 %894, %v559_v15   ;;  %v576_v14 = vld [vmem:[%s1266_s2 + $0xc8] sm:$0xff]  ;;  %v575_v15 = vld [vmem:[%s1266_s2 + $0xc0] sm:$0xff] }
  0x65   :  { %317 = vmatmul.mubr.f32.gmra.mxu0 %v173_v16  ;;  %397 = vmatmul.mubr.f32.gmra.mxu1 %v205_v17  ;;  %v189_v16 = vunpack.c.l.bf16 %v144_v4  ;;  %v221_v17 = vunpack.c.l.bf16 %v160_v5 }
  0x66   :  { %321 = vmatprep.mubr.f32.mxu0 %v176_v18  ;;  %401 = vmatprep.mubr.f32.mxu1 %v208_v19  ;;  %v192_v18 = vunpack.c.h.bf16 %v145_v12  ;;  %v224_v19 = vunpack.c.h.bf16 %v161_v13 }
  0x67   :  { %640 = vperm.xlu1 %895, %v562_v22   ;;  %635 = vperm.xlu0 %894, %v561_v23   ;;  %v578_v22 = vld [vmem:[%s1266_s2 + $0xd8] sm:$0xff]  ;;  %v577_v23 = vld [vmem:[%s1266_s2 + $0xd0] sm:$0xff] }
  0x69   :  { %322 = vmatmul.mubr.f32.gmra.mxu0 %v175_v24  ;;  %402 = vmatmul.mubr.f32.gmra.mxu1 %v207_v25  ;;  %v191_v24 = vunpack.c.l.bf16 %v145_v12  ;;  %v223_v25 = vunpack.c.l.bf16 %v161_v13 }
  0x6a   :  { %326 = vmatprep.mubr.f32.mxu0 %v178_v26  ;;  %406 = vmatprep.mubr.f32.mxu1 %v210_v27  ;;  %v194_v26 = vunpack.c.h.bf16 %v146_v20  ;;  %v226_v27 = vunpack.c.h.bf16 %v162_v21 }
  0x6b   :  { %650 = vperm.xlu1 %895, %v564_v30   ;;  %645 = vperm.xlu0 %894, %v563_v31   ;;  %v193_v30 = vunpack.c.l.bf16 %v146_v20  ;;  %v225_v31 = vunpack.c.l.bf16 %v162_v21 }
  0x6d   :  { %327 = vmatmul.mubr.f32.gmra.mxu0 %v177_v32  ;;  %407 = vmatmul.mubr.f32.gmra.mxu1 %v209_v33  ;;  %v582_v32 = vld [vmem:[%s1266_s2 + $0xf8] sm:$0xff]  ;;  %v581_v33 = vld [vmem:[%s1266_s2 + $0xf0] sm:$0xff]  ;;  %s945_s2 = smov [#allocation5]  }
  0x6e   :  { %331 = vmatprep.mubr.f32.mxu0 %v180_v34  ;;  %411 = vmatprep.mubr.f32.mxu1 %v212_v35  ;;  %s812_s14 = sshll.u32 %s945_s2, 4  ;;  %s813_s14 = int_to_ptr.vmem [resolvable:$true] %s812_s14 }
  0x6f   :  { %660 = vperm.xlu1 %895, %v566_v38   ;;  %655 = vperm.xlu0 %894, %v565_v39   ;;  %s916_s17 = scalar_lea.vmem %s813_s14, 4096  ;;  %p921_p6 = scmp.lt.s32.totalorder %s813_s14, %s813_s14 }
  0x70   :  { %p917_p5 = scmp.ne.s32.totalorder %s813_s14, %s916_s17  ;;  %p922_p7 = scmp.lt.s32.totalorder %s916_s17, %s916_s17 }
  0x71   :  { %332 = vmatmul.mubr.f32.gmra.mxu0 %v179_v40  ;;  %412 = vmatmul.mubr.f32.gmra.mxu1 %v211_v41 }
  0x72   :  { %336 = vmatprep.mubr.f32.mxu0 %v182_v42  ;;  %416 = vmatprep.mubr.f32.mxu1 %v214_v43  ;;  %p923_p8 = por %p922_p7, %p921_p6 }
  0x73   :  { %670 = vperm.xlu1 %895, %v568_v46   ;;  %665 = vperm.xlu0 %894, %v567_v47  }
  0x74   :  { %p924_p9 = pnand %p923_p8, %p917_p5 }
  0x75   :  { %337 = vmatmul.mubr.f32.gmra.mxu0 %v181_v48  ;;  %417 = vmatmul.mubr.f32.gmra.mxu1 %v213_v49 }
  0x76   :  { %341 = vmatprep.mubr.f32.mxu0 %v184_v50  ;;  %421 = vmatprep.mubr.f32.mxu1 %v216_v51 }
  0x77   :  { %680 = vperm.xlu1 %895, %v570_v54   ;;  %675 = vperm.xlu0 %894, %v569_v55  }
  0x79   :  { %342 = vmatmul.mubr.f32.gmra.mxu0 %v183_v56  ;;  %422 = vmatmul.mubr.f32.gmra.mxu1 %v215_v57 }
  0x7a   :  { %346 = vmatprep.mubr.f32.mxu0 %v186_v58  ;;  %426 = vmatprep.mubr.f32.mxu1 %v218_v59 }
  0x7b   :  { %690 = vperm.xlu1 %895, %v572_v62   ;;  %685 = vperm.xlu0 %894, %v571_v63  }
  0x7d   :  { %347 = vmatmul.mubr.f32.gmra.mxu0 %v185_v0  ;;  %427 = vmatmul.mubr.f32.gmra.mxu1 %v217_v1 }
  0x7e   :  { %351 = vmatprep.mubr.f32.mxu0 %v188_v2  ;;  %431 = vmatprep.mubr.f32.mxu1 %v220_v3 }
  0x7f   :  { %700 = vperm.xlu1 %895, %v574_v6   ;;  %695 = vperm.xlu0 %894, %v573_v7  }
  0x81   :  { %352 = vmatmul.mubr.f32.gmra.mxu0 %v187_v8  ;;  %432 = vmatmul.mubr.f32.gmra.mxu1 %v219_v9 }
  0x82   :  { %356 = vmatprep.mubr.f32.mxu0 %v190_v10  ;;  %436 = vmatprep.mubr.f32.mxu1 %v222_v11 }
  0x83   :  { %710 = vperm.xlu1 %895, %v576_v14   ;;  %705 = vperm.xlu0 %894, %v575_v15  }
  0x85   :  { %357 = vmatmul.mubr.f32.gmra.mxu0 %v189_v16  ;;  %437 = vmatmul.mubr.f32.gmra.mxu1 %v221_v17 }
  0x86   :  { %361 = vmatprep.mubr.f32.mxu0 %v192_v18  ;;  %441 = vmatprep.mubr.f32.mxu1 %v224_v19 }
  0x87   :  { %720 = vperm.xlu1 %895, %v578_v22   ;;  %715 = vperm.xlu0 %894, %v577_v23  }
  0x89   :  { %362 = vmatmul.mubr.f32.gmra.mxu0 %v191_v24  ;;  %442 = vmatmul.mubr.f32.gmra.mxu1 %v223_v25 }
  0x8a   :  { %366 = vmatprep.mubr.f32.mxu0 %v194_v26  ;;  %446 = vmatprep.mubr.f32.mxu1 %v226_v27 }
  0x8b   :  { %730 = vperm.xlu1 %895, %v580_v28   ;;  %725 = vperm.xlu0 %894, %v579_v29  }
  0x8d   :  { %367 = vmatmul.mubr.f32.gmra.mxu0 %v193_v30  ;;  %447 = vmatmul.mubr.f32.gmra.mxu1 %v225_v31 }
  0x8f   :  { %740 = vperm.xlu1 %895, %v582_v32   ;;  %735 = vperm.xlu0 %894, %v581_v33  }
  0xce   :  { %v586_v34 = vpop.permute.xlu0 %585  ;;  %v596_v35 = vpop.permute.xlu1 %595 }
  0xd2   :  { %v591_v36 = vpop.permute.xlu0 %590  ;;  %v601_v37 = vpop.permute.xlu1 %600 }
  0xd6   :  { %v606_v38 = vpop.permute.xlu0 %605  ;;  %v611_v39 = vpop.permute.xlu1 %610 }
  0xda   :  { %v1228_v40 = vpop.permute.xlu0 %615  ;;  %v1230_v41 = vpop.permute.xlu1 %620 }
  0xde   :  { %v1232_v42 = vpop.permute.xlu0 %625  ;;  %v1234_v43 = vpop.permute.xlu1 %630 }
  0xe2   :  { %v1236_v44 = vpop.permute.xlu0 %635  ;;  %v1238_v45 = vpop.permute.xlu1 %640 }
  0xe6   :  { %v1240_v46 = vpop.permute.xlu0 %645  ;;  %v1242_v47 = vpop.permute.xlu1 %650 }
  0xea   :  { %v1244_v48 = vpop.permute.xlu0 %655  ;;  %v1246_v49 = vpop.permute.xlu1 %660 }
  0xee   :  { %v666_v52 = vpop.permute.xlu0 %665  ;;  %v671_v59 = vpop.permute.xlu1 %670 }
  0xf2   :  { %v676_v2 = vpop.permute.xlu0 %675  ;;  %v681_v9 = vpop.permute.xlu1 %680 }
  0xf6   :  { %v686_v16 = vpop.permute.xlu0 %685  ;;  %v691_v23 = vpop.permute.xlu1 %690 }
  0xfa   :  { %v696_v30 = vpop.permute.xlu0 %695 }
 0x111   :  { %v293_v50 = vpop.f32.mrf.mxu0  ;;  %v373_v51 = vpop.f32.mrf.mxu1 }
 0x112   :  { %v743_v55 = vmul.f32 %v586_v34, %v293_v50  ;;  %v759_v56 = vmul.f32 %v666_v52, %v373_v51 }
 0x113   :  { %v295_v53 = vpop.f32.mrf.mxu0  ;;  %v375_v54 = vpop.f32.mrf.mxu1 }
 0x114   :  { %775 = vst [vmem:[#allocation5] sm:$0xff] %v743_v55  ;;  %791 = vst [vmem:[#allocation5 + $0x80] sm:$0xff] %v759_v56  ;;  %v706_v54 = vpop.permute.xlu0 %705 }
 0x115   :  { %v298_v57 = vpop.f32.mrf.mxu0  ;;  %v378_v58 = vpop.f32.mrf.mxu1 }
 0x116   :  { %v744_v62 = vmul.f32 %v591_v36, %v298_v57  ;;  %v760_v63 = vmul.f32 %v671_v59, %v378_v58 }
 0x117   :  { %v300_v60 = vpop.f32.mrf.mxu0  ;;  %v380_v61 = vpop.f32.mrf.mxu1 }
 0x118   :  { %776 = vst [vmem:[#allocation5 + $0x8] sm:$0xff] %v744_v62  ;;  %792 = vst [vmem:[#allocation5 + $0x88] sm:$0xff] %v760_v63 }
 0x119   :  { %v303_v0 = vpop.f32.mrf.mxu0  ;;  %v383_v1 = vpop.f32.mrf.mxu1 }
 0x11a   :  { %v745_v5 = vmul.f32 %v596_v35, %v303_v0  ;;  %v761_v6 = vmul.f32 %v676_v2, %v383_v1  ;;  %v716_v2 = vpop.permute.xlu0 %715 }
 0x11b   :  { %v305_v3 = vpop.f32.mrf.mxu0  ;;  %v385_v4 = vpop.f32.mrf.mxu1 }
 0x11c   :  { %777 = vst [vmem:[#allocation5 + $0x10] sm:$0xff] %v745_v5  ;;  %793 = vst [vmem:[#allocation5 + $0x90] sm:$0xff] %v761_v6 }
 0x11d   :  { %v308_v7 = vpop.f32.mrf.mxu0  ;;  %v388_v8 = vpop.f32.mrf.mxu1 }
 0x11e   :  { %v746_v12 = vmul.f32 %v601_v37, %v308_v7  ;;  %v762_v13 = vmul.f32 %v681_v9, %v388_v8  ;;  %v701_v37 = vpop.permute.xlu1 %700 }
 0x11f   :  { %v310_v10 = vpop.f32.mrf.mxu0  ;;  %v390_v11 = vpop.f32.mrf.mxu1 }
 0x120   :  { %778 = vst [vmem:[#allocation5 + $0x18] sm:$0xff] %v746_v12  ;;  %794 = vst [vmem:[#allocation5 + $0x98] sm:$0xff] %v762_v13 }
 0x121   :  { %v313_v14 = vpop.f32.mrf.mxu0  ;;  %v393_v15 = vpop.f32.mrf.mxu1 }
 0x122   :  { %v747_v19 = vmul.f32 %v606_v38, %v313_v14  ;;  %v763_v20 = vmul.f32 %v686_v16, %v393_v15  ;;  %v711_v60 = vpop.permute.xlu1 %710  ;;  %v726_v14 = vpop.permute.xlu0 %725 }
 0x123   :  { %v315_v17 = vpop.f32.mrf.mxu0  ;;  %v395_v18 = vpop.f32.mrf.mxu1 }
 0x124   :  { %779 = vst [vmem:[#allocation5 + $0x20] sm:$0xff] %v747_v19  ;;  %795 = vst [vmem:[#allocation5 + $0xa0] sm:$0xff] %v763_v20 }
 0x125   :  { %v318_v21 = vpop.f32.mrf.mxu0  ;;  %v398_v22 = vpop.f32.mrf.mxu1 }
 0x126   :  { %v748_v26 = vmul.f32 %v611_v39, %v318_v21  ;;  %v764_v27 = vmul.f32 %v691_v23, %v398_v22  ;;  %v721_v8 = vpop.permute.xlu1 %720 }
 0x127   :  { %v320_v24 = vpop.f32.mrf.mxu0  ;;  %v400_v25 = vpop.f32.mrf.mxu1 }
 0x128   :  { %780 = vst [vmem:[#allocation5 + $0x28] sm:$0xff] %v748_v26  ;;  %796 = vst [vmem:[#allocation5 + $0xa8] sm:$0xff] %v764_v27  ;;  %v736_v26 = vpop.permute.xlu0 %735 }
 0x129   :  { %v323_v28 = vpop.f32.mrf.mxu0  ;;  %v403_v29 = vpop.f32.mrf.mxu1 }
 0x12a   :  { %v749_v33 = vmul.f32 %v1228_v40, %v323_v28  ;;  %v765_v34 = vmul.f32 %v696_v30, %v403_v29  ;;  %v731_v20 = vpop.permute.xlu1 %730 }
 0x12b   :  { %v325_v31 = vpop.f32.mrf.mxu0  ;;  %v405_v32 = vpop.f32.mrf.mxu1 }
 0x12c   :  { %781 = vst [vmem:[#allocation5 + $0x30] sm:$0xff] %v749_v33  ;;  %797 = vst [vmem:[#allocation5 + $0xb0] sm:$0xff] %v765_v34 }
 0x12d   :  { %v328_v35 = vpop.f32.mrf.mxu0  ;;  %v408_v36 = vpop.f32.mrf.mxu1 }
 0x12e   :  { %v750_v39 = vmul.f32 %v1230_v41, %v328_v35  ;;  %v766_v51 = vmul.f32 %v701_v37, %v408_v36  ;;  %v741_v32 = vpop.permute.xlu1 %740 }
 0x12f   :  { %v330_v38 = vpop.f32.mrf.mxu0  ;;  %v410_v50 = vpop.f32.mrf.mxu1 }
 0x130   :  { %782 = vst [vmem:[#allocation5 + $0x38] sm:$0xff] %v750_v39  ;;  %798 = vst [vmem:[#allocation5 + $0xb8] sm:$0xff] %v766_v51 }
 0x131   :  { %v333_v52 = vpop.f32.mrf.mxu0  ;;  %v413_v53 = vpop.f32.mrf.mxu1 }
 0x132   :  { %v751_v40 = vmul.f32 %v1232_v42, %v333_v52  ;;  %v767_v57 = vmul.f32 %v706_v54, %v413_v53 }
 0x133   :  { %v335_v55 = vpop.f32.mrf.mxu0  ;;  %v415_v56 = vpop.f32.mrf.mxu1 }
 0x134   :  { %783 = vst [vmem:[#allocation5 + $0x40] sm:$0xff] %v751_v40  ;;  %799 = vst [vmem:[#allocation5 + $0xc0] sm:$0xff] %v767_v57 }
 0x135   :  { %v338_v58 = vpop.f32.mrf.mxu0  ;;  %v418_v59 = vpop.f32.mrf.mxu1 }
 0x136   :  { %v752_v41 = vmul.f32 %v1234_v43, %v338_v58  ;;  %v768_v63 = vmul.f32 %v711_v60, %v418_v59 }
 0x137   :  { %v340_v61 = vpop.f32.mrf.mxu0  ;;  %v420_v62 = vpop.f32.mrf.mxu1 }
 0x138   :  { %784 = vst [vmem:[#allocation5 + $0x48] sm:$0xff] %v752_v41  ;;  %800 = vst [vmem:[#allocation5 + $0xc8] sm:$0xff] %v768_v63 }
 0x139   :  { %v343_v0 = vpop.f32.mrf.mxu0  ;;  %v423_v1 = vpop.f32.mrf.mxu1 }
 0x13a   :  { %v753_v42 = vmul.f32 %v1236_v44, %v343_v0  ;;  %v769_v5 = vmul.f32 %v716_v2, %v423_v1 }
 0x13b   :  { %v345_v3 = vpop.f32.mrf.mxu0  ;;  %v425_v4 = vpop.f32.mrf.mxu1 }
 0x13c   :  { %785 = vst [vmem:[#allocation5 + $0x50] sm:$0xff] %v753_v42  ;;  %801 = vst [vmem:[#allocation5 + $0xd0] sm:$0xff] %v769_v5 }
 0x13d   :  { %v348_v6 = vpop.f32.mrf.mxu0  ;;  %v428_v7 = vpop.f32.mrf.mxu1 }
 0x13e   :  { %v754_v43 = vmul.f32 %v1238_v45, %v348_v6  ;;  %v770_v11 = vmul.f32 %v721_v8, %v428_v7 }
 0x13f   :  { %v350_v9 = vpop.f32.mrf.mxu0  ;;  %v430_v10 = vpop.f32.mrf.mxu1 }
 0x140   :  { %786 = vst [vmem:[#allocation5 + $0x58] sm:$0xff] %v754_v43  ;;  %802 = vst [vmem:[#allocation5 + $0xd8] sm:$0xff] %v770_v11 }
 0x141   :  { %v353_v12 = vpop.f32.mrf.mxu0  ;;  %v433_v13 = vpop.f32.mrf.mxu1 }
 0x142   :  { %v755_v44 = vmul.f32 %v1240_v46, %v353_v12  ;;  %v771_v17 = vmul.f32 %v726_v14, %v433_v13 }
 0x143   :  { %v355_v15 = vpop.f32.mrf.mxu0  ;;  %v435_v16 = vpop.f32.mrf.mxu1 }
 0x144   :  { %787 = vst [vmem:[#allocation5 + $0x60] sm:$0xff] %v755_v44  ;;  %803 = vst [vmem:[#allocation5 + $0xe0] sm:$0xff] %v771_v17 }
 0x145   :  { %v358_v18 = vpop.f32.mrf.mxu0  ;;  %v438_v19 = vpop.f32.mrf.mxu1 }
 0x146   :  { %v756_v45 = vmul.f32 %v1242_v47, %v358_v18  ;;  %v772_v23 = vmul.f32 %v731_v20, %v438_v19 }
 0x147   :  { %v360_v21 = vpop.f32.mrf.mxu0  ;;  %v440_v22 = vpop.f32.mrf.mxu1 }
 0x148   :  { %788 = vst [vmem:[#allocation5 + $0x68] sm:$0xff] %v756_v45  ;;  %804 = vst [vmem:[#allocation5 + $0xe8] sm:$0xff] %v772_v23 }
 0x149   :  { %v363_v24 = vpop.f32.mrf.mxu0  ;;  %v443_v25 = vpop.f32.mrf.mxu1 }
 0x14a   :  { %v757_v46 = vmul.f32 %v1244_v48, %v363_v24  ;;  %v773_v29 = vmul.f32 %v736_v26, %v443_v25 }
 0x14b   :  { %v365_v27 = vpop.f32.mrf.mxu0  ;;  %v445_v28 = vpop.f32.mrf.mxu1 }
 0x14c   :  { %789 = vst [vmem:[#allocation5 + $0x70] sm:$0xff] %v757_v46  ;;  %805 = vst [vmem:[#allocation5 + $0xf0] sm:$0xff] %v773_v29 }
 0x14d   :  { %v368_v30 = vpop.f32.mrf.mxu0  ;;  %v448_v31 = vpop.f32.mrf.mxu1 }
 0x14e   :  { %v758_v34 = vmul.f32 %v1246_v49, %v368_v30  ;;  %v774_v35 = vmul.f32 %v741_v32, %v448_v31 }
 0x14f   :  { %v370_v33 = vpop.f32.mrf.mxu0  ;;  %v450_v47 = vpop.f32.mrf.mxu1 }
 0x150   :  { %790 = vst [vmem:[#allocation5 + $0x78] sm:$0xff] %v758_v34  ;;  %806 = vst [vmem:[#allocation5 + $0xf8] sm:$0xff] %v774_v35 }
 0x151   :  { %927 = shalt.err (!%p924_p9)
}
 0x152   :  { %818 = dma.vmem_to_hbm [thread:$0]  %s813_s14, 4096, %s1267_s3, [#allocation4], %s941_s15, %s941_s15, %s942_s16  }
 0x153   :  { %938 = dma.done.wait [#allocation4], 4096  }
 0x154   :  { %939 = vsyncadd [#allocation4], 4294963200 }
 0x155   :  { %822 = vsyncpa [#allocation3], 1 }
 0x156   :  { %823 = vsyncpa [#allocation4], 1 }

</bundles_post_ra>
